<compile_context>
chip_gen: v7x
topology: tpu7x:2x2x1
jax: 0.10.0
libtpu: 0.0.40
codegen_flags: <defaults>
</compile_context>

<pallas_src>
import functools

import jax
import jax.numpy as jnp
from jax import lax
from jax.experimental import pallas as pl
from jax.experimental.pallas import tpu as pltpu


# -----------------------------------------------------------------------------
# Fused forward kernel: conv1 + relu1 + conv2 + relu2 + GAP, all in VMEM.
# -----------------------------------------------------------------------------
def _fused_forward_kernel(mask_ref, x_ref, w1_ref, b1_ref, w2_ref, b2_ref,
                          conv1_ref, relu1_ref, gap_ref, *, H, W):
    # Per grid step (B_TILE images):
    #   mask_ref : (9, H*W)              f32   border-validity masks (batch-invariant)
    #   x_ref    : (BT, CIN_PAD, H*W)    f32   flattened NCHW images (Cin zero-padded)
    #   w1_ref   : (C1, 9*CIN_PAD)       bf16  conv1 weights, (dh, dw, ci) column order
    #   b1_ref   : (C1, 1)               f32
    #   w2_ref   : (C2, 9*C1)            bf16
    #   b2_ref   : (C2, 1)               f32
    #   conv1_ref: (BT, C1, H*W)         f32   conv1 output  (= input to relu1)
    #   relu1_ref: (BT, C1, H*W)         f32   relu1 output  (= input to conv2)
    #   gap_ref  : (BT, C2, 1)           f32   GAP(relu2(conv2)) (= input to fc)
    HW = H * W
    masks = mask_ref[...]                                      # (9, HW) f32

    def build_patches(act):
        # act: (C, HW) f32 -> (9*C, HW) bf16 im2col patches.
        # Each tap is one XLU lane-roll plus one mask multiply; the roll keeps
        # valid positions inside their own image row-block, the mask zeroes
        # borders (and the wrap-around positions).  Center tap needs neither.
        blocks = []
        k = 0
        for dh in range(3):
            for dw in range(3):
                off = (dh - 1) * W + (dw - 1)
                if off == 0:
                    blocks.append(act)
                else:
                    sh = pltpu.roll(act, shift=(-off) % HW, axis=1)
                    blocks.append(sh * masks[k:k + 1, :])
                k += 1
        # 9 blocks of CIN_PAD (=8) sublanes each -> tile-aligned concat.
        return jnp.concatenate(blocks, axis=0).astype(jnp.bfloat16)

    bt = x_ref.shape[0]
    for b in range(bt):                                        # static unroll
        x = x_ref[b]                                           # (CIN_PAD, HW) f32

        # conv1 + bias, relu1
        c1 = jnp.dot(w1_ref[...], build_patches(x),
                     preferred_element_type=jnp.float32) + b1_ref[...]
        r1 = jnp.maximum(c1, 0.0)
        conv1_ref[b] = c1
        relu1_ref[b] = r1

        # conv2 + bias, relu2, global-average-pool (fc input). conv2's full
        # output is NOT written to HBM (not consumed by the hooked layers).
        c2 = jnp.dot(w2_ref[...], build_patches(r1),
                     preferred_element_type=jnp.float32) + b2_ref[...]
        r2 = jnp.maximum(c2, 0.0)
        gap_ref[b] = jnp.sum(r2, axis=1, keepdims=True) * (1.0 / HW)


def _border_masks(h, w):
    # (9, h*w) f32 validity masks for the 3x3 'same' conv taps, row order (dh, dw).
    pos = jnp.arange(h * w, dtype=jnp.int32)
    row = pos // w
    col = pos % w
    ms = []
    for dh in range(3):
        for dw in range(3):
            rr = row + (dh - 1)
            cc = col + (dw - 1)
            valid = (rr >= 0) & (rr < h) & (cc >= 0) & (cc < w)
            ms.append(valid.astype(jnp.float32))
    return jnp.stack(ms, axis=0)


@jax.jit
def fused_feature_forward(x_nchw, conv1_w, conv1_b, conv2_w, conv2_b):
    """Runs the synthetic CNN and returns the hookable layers' *inputs*."""
    n, cin, h, w = x_nchw.shape
    hw = h * w
    c1 = conv1_w.shape[0]
    c2 = conv2_w.shape[0]
    cin_pad = ((cin + 7) // 8) * 8                             # sublane-align Cin

    # Batch tiling: B_TILE images per grid step; keep >= 2 steps when n >= 2 so
    # v7x's two TensorCores both get work; cap B_TILE for VMEM headroom.
    bt = min(max(1, -(-n // 2)), 32)
    num_steps = -(-n // bt)
    n_pad = num_steps * bt

    x_flat = x_nchw.reshape(n, cin, hw)                        # lane-dense (last dim 256)
    if cin_pad != cin:
        x_flat = jnp.pad(x_flat, ((0, 0), (0, cin_pad - cin), (0, 0)))
    if n_pad != n:
        x_flat = jnp.pad(x_flat, ((0, n_pad - n), (0, 0), (0, 0)))

    # (Cout, Cin, kh, kw) -> (Cout, kh*kw*Cin) matching the in-kernel patch order.
    w1p = conv1_w
    if cin_pad != cin:
        w1p = jnp.pad(conv1_w, ((0, 0), (0, cin_pad - cin), (0, 0), (0, 0)))
    w1_mat = jnp.transpose(w1p, (0, 2, 3, 1)).reshape(c1, 9 * cin_pad).astype(jnp.bfloat16)
    w2_mat = jnp.transpose(conv2_w, (0, 2, 3, 1)).reshape(c2, 9 * c1).astype(jnp.bfloat16)
    b1 = conv1_b.reshape(c1, 1)
    b2 = conv2_b.reshape(c2, 1)
    masks = _border_masks(h, w)                                # batch-invariant, hoisted

    conv1_o, relu1_o, gap_o = pl.pallas_call(
        functools.partial(_fused_forward_kernel, H=h, W=w),
        out_shape=(
            jax.ShapeDtypeStruct((n_pad, c1, hw), jnp.float32),
            jax.ShapeDtypeStruct((n_pad, c1, hw), jnp.float32),
            jax.ShapeDtypeStruct((n_pad, c2, 1), jnp.float32),
        ),
        grid=(num_steps,),
        in_specs=[
            pl.BlockSpec((9, hw), lambda i: (0, 0)),
            pl.BlockSpec((bt, cin_pad, hw), lambda i: (i, 0, 0)),
            pl.BlockSpec((c1, 9 * cin_pad), lambda i: (0, 0)),
            pl.BlockSpec((c1, 1), lambda i: (0, 0)),
            pl.BlockSpec((c2, 9 * c1), lambda i: (0, 0)),
            pl.BlockSpec((c2, 1), lambda i: (0, 0)),
        ],
        out_specs=(
            pl.BlockSpec((bt, c1, hw), lambda i: (i, 0, 0)),
            pl.BlockSpec((bt, c1, hw), lambda i: (i, 0, 0)),
            pl.BlockSpec((bt, c2, 1), lambda i: (i, 0, 0)),
        ),
        compiler_params=pltpu.CompilerParams(
            dimension_semantics=("parallel",)),
    )(masks, x_flat, w1_mat, b1, w2_mat, b2)

    conv1_o = conv1_o[:n]
    relu1_o = relu1_o[:n]
    gap_o = gap_o[:n]

    # Captured "inputs to layer X" (specialized to the hooked-layer set).
    return {
        "conv1": x_nchw,                          # input to conv1
        "relu1": conv1_o.reshape(n, c1, h, w),    # input to relu1 (already NCHW)
        "conv2": relu1_o.reshape(n, c1, h, w),    # input to conv2
        "fc": gap_o.reshape(n, c2),               # input to fc (GAP + flatten)
    }


# -----------------------------------------------------------------------------
# Synthetic model parameters (deterministic, in-script, PyTorch-style layouts)
# -----------------------------------------------------------------------------
def init_model_params():
    ks = jax.random.split(jax.random.PRNGKey(42), 6)

    def u(k, shape, fan_in):
        bound = 1.0 / (fan_in ** 0.5)
        return jax.random.uniform(k, shape, jnp.float32, -bound, bound)

    return {
        "conv1_w": u(ks[0], (8, 4, 3, 3), 4 * 9),    # (Cout, Cin, kh, kw)
        "conv1_b": u(ks[1], (8,), 4 * 9),
        "conv2_w": u(ks[2], (16, 8, 3, 3), 8 * 9),
        "conv2_b": u(ks[3], (16,), 8 * 9),
        "fc_w": u(ks[4], (10, 16), 16),              # unused: fc output is discarded
        "fc_b": u(ks[5], (10,), 16),
    }


# -----------------------------------------------------------------------------
# FeatureExtractor (hook semantics: features[layer_id] = tuple of layer *inputs*)
# -----------------------------------------------------------------------------
class FeatureExtractor:
    def __init__(self, layers):
        self.params = init_model_params()
        self.layers = list(layers)
        # before forward: empty tensors, mirroring torch.empty(0)
        self._features = {layer: jnp.empty((0,), jnp.float32) for layer in layers}
        self.handlers = {layer: None for layer in layers}

    def forward(self, x_nchw):
        p = self.params
        captured = fused_feature_forward(
            x_nchw, p["conv1_w"], p["conv1_b"], p["conv2_w"], p["conv2_b"])
        # The original forward discards the model output; the fc matmul is skipped
        # on purpose (only its input, the GAP result, is hook-captured).
        for layer_id in self.layers:
            self._features[layer_id] = (captured[layer_id],)
        return self._features

    def remove_handler(self):
        for layer_id in self.handlers:
            self.handlers[layer_id] = None


# -----------------------------------------------------------------------------
if __name__ == "__main__":
    key = jax.random.PRNGKey(0)
    x = jax.random.normal(key, (2, 4, 16, 16), jnp.float32)    # NCHW like PyTorch

    extractor = FeatureExtractor(layers=["relu1", "conv2", "fc"])
    feats = extractor.forward(x)
    feats = jax.block_until_ready(feats)

    assert feats["relu1"][0].shape == (2, 8, 16, 16)
    assert feats["conv2"][0].shape == (2, 8, 16, 16)
    assert feats["fc"][0].shape == (2, 16)
    assert all(bool(jnp.all(jnp.isfinite(f[0]))) for f in feats.values())

    # Pure-JAX reference (operands bf16-rounded to mirror the kernel's MXU inputs).
    p = extractor.params

    def conv_ref(a, w, b):
        y = lax.conv_general_dilated(
            a.astype(jnp.bfloat16).astype(jnp.float32),
            w.astype(jnp.bfloat16).astype(jnp.float32),
            (1, 1), "SAME", dimension_numbers=("NCHW", "OIHW", "NCHW"))
        return y + b[None, :, None, None]

    c1_ref = conv_ref(x, p["conv1_w"], p["conv1_b"])           # input to relu1
    r1_ref = jnp.maximum(c1_ref, 0.0)                          # input to conv2
    c2_ref = conv_ref(r1_ref, p["conv2_w"], p["conv2_b"])
    flat_ref = jnp.maximum(c2_ref, 0.0).mean(axis=(2, 3))      # input to fc

    assert jnp.allclose(feats["relu1"][0], c1_ref, rtol=1e-2, atol=1e-2)
    assert jnp.allclose(feats["conv2"][0], r1_ref, rtol=1e-2, atol=1e-2)
    assert jnp.allclose(feats["fc"][0], flat_ref, rtol=1e-2, atol=1e-2)

    print("KERNEL_OK")
</pallas_src>

<mosaic_0001>
module attributes {stable_mosaic.version = 11 : i64} {
  func.func @_fused_forward_kernel(%arg0: i32, %arg1: memref<9x256xf32, #tpu.memory_space<vmem>>, %arg2: memref<1x8x256xf32, #tpu.memory_space<vmem>>, %arg3: memref<8x72xbf16, #tpu.memory_space<vmem>>, %arg4: memref<8x1xf32, #tpu.memory_space<vmem>>, %arg5: memref<16x72xbf16, #tpu.memory_space<vmem>>, %arg6: memref<16x1xf32, #tpu.memory_space<vmem>>, %arg7: memref<1x8x256xf32, #tpu.memory_space<vmem>>, %arg8: memref<1x8x256xf32, #tpu.memory_space<vmem>>, %arg9: memref<1x16x1xf32, #tpu.memory_space<vmem>>) attributes {dimension_semantics = [#tpu.dimension_semantics<parallel>], iteration_bounds = array<i64: 2>, scalar_prefetch = 0 : i64, scratch_operands = 0 : i64, tpu.core_type = #tpu.core_type<tc>, window_params = [{pipeline_mode = #tpu.pipeline_mode<synchronous>, transform_indices = @transform_0, window_bounds = array<i64: 9, 256>}, {transform_indices = @transform_1, window_bounds = array<i64: 1, 8, 256>}, {pipeline_mode = #tpu.pipeline_mode<synchronous>, transform_indices = @transform_2, window_bounds = array<i64: 8, 72>}, {pipeline_mode = #tpu.pipeline_mode<synchronous>, transform_indices = @transform_3, window_bounds = array<i64: 8, 1>}, {pipeline_mode = #tpu.pipeline_mode<synchronous>, transform_indices = @transform_4, window_bounds = array<i64: 16, 72>}, {pipeline_mode = #tpu.pipeline_mode<synchronous>, transform_indices = @transform_5, window_bounds = array<i64: 16, 1>}, {transform_indices = @transform_6, window_bounds = array<i64: 1, 8, 256>}, {transform_indices = @transform_7, window_bounds = array<i64: 1, 8, 256>}, {transform_indices = @transform_8, window_bounds = array<i64: 1, 16, 1>}]} {
    %c0 = arith.constant 0 : index
    %c0_0 = arith.constant 0 : index
    %0 = vector.load %arg1[%c0, %c0_0] : memref<9x256xf32, #tpu.memory_space<vmem>>, vector<9x256xf32>
    %c0_1 = arith.constant 0 : index
    %c0_2 = arith.constant 0 : index
    %c0_3 = arith.constant 0 : index
    %1 = vector.load %arg2[%c0_1, %c0_2, %c0_3] : memref<1x8x256xf32, #tpu.memory_space<vmem>>, vector<1x8x256xf32>
    %2 = vector.shape_cast %1 : vector<1x8x256xf32> to vector<8x256xf32>
    %c0_4 = arith.constant 0 : index
    %c0_5 = arith.constant 0 : index
    %3 = vector.load %arg3[%c0_4, %c0_5] : memref<8x72xbf16, #tpu.memory_space<vmem>>, vector<8x72xbf16>
    %c17_i32 = arith.constant 17 : i32
    %4 = tpu.dynamic_rotate %2 by %c17_i32 dim 1 : vector<8x256xf32>, i32 -> vector<8x256xf32>
    %5 = vector.extract_strided_slice %0 {offsets = [0, 0], sizes = [1, 256], strides = [1, 1]} : vector<9x256xf32> to vector<1x256xf32>
    %6 = vector.broadcast %5 : vector<1x256xf32> to vector<8x256xf32>
    %7 = arith.mulf %4, %6 : vector<8x256xf32>
    %c16_i32 = arith.constant 16 : i32
    %8 = tpu.dynamic_rotate %2 by %c16_i32 dim 1 : vector<8x256xf32>, i32 -> vector<8x256xf32>
    %9 = vector.extract_strided_slice %0 {offsets = [1, 0], sizes = [1, 256], strides = [1, 1]} : vector<9x256xf32> to vector<1x256xf32>
    %10 = vector.broadcast %9 : vector<1x256xf32> to vector<8x256xf32>
    %11 = arith.mulf %8, %10 : vector<8x256xf32>
    %c15_i32 = arith.constant 15 : i32
    %12 = tpu.dynamic_rotate %2 by %c15_i32 dim 1 : vector<8x256xf32>, i32 -> vector<8x256xf32>
    %13 = vector.extract_strided_slice %0 {offsets = [2, 0], sizes = [1, 256], strides = [1, 1]} : vector<9x256xf32> to vector<1x256xf32>
    %14 = vector.broadcast %13 : vector<1x256xf32> to vector<8x256xf32>
    %15 = arith.mulf %12, %14 : vector<8x256xf32>
    %c1_i32 = arith.constant 1 : i32
    %16 = tpu.dynamic_rotate %2 by %c1_i32 dim 1 : vector<8x256xf32>, i32 -> vector<8x256xf32>
    %17 = vector.extract_strided_slice %0 {offsets = [3, 0], sizes = [1, 256], strides = [1, 1]} : vector<9x256xf32> to vector<1x256xf32>
    %18 = vector.broadcast %17 : vector<1x256xf32> to vector<8x256xf32>
    %19 = arith.mulf %16, %18 : vector<8x256xf32>
    %c255_i32 = arith.constant 255 : i32
    %20 = tpu.dynamic_rotate %2 by %c255_i32 dim 1 : vector<8x256xf32>, i32 -> vector<8x256xf32>
    %21 = vector.extract_strided_slice %0 {offsets = [5, 0], sizes = [1, 256], strides = [1, 1]} : vector<9x256xf32> to vector<1x256xf32>
    %22 = vector.broadcast %21 : vector<1x256xf32> to vector<8x256xf32>
    %23 = arith.mulf %20, %22 : vector<8x256xf32>
    %c241_i32 = arith.constant 241 : i32
    %24 = tpu.dynamic_rotate %2 by %c241_i32 dim 1 : vector<8x256xf32>, i32 -> vector<8x256xf32>
    %25 = vector.extract_strided_slice %0 {offsets = [6, 0], sizes = [1, 256], strides = [1, 1]} : vector<9x256xf32> to vector<1x256xf32>
    %26 = vector.broadcast %25 : vector<1x256xf32> to vector<8x256xf32>
    %27 = arith.mulf %24, %26 : vector<8x256xf32>
    %c240_i32 = arith.constant 240 : i32
    %28 = tpu.dynamic_rotate %2 by %c240_i32 dim 1 : vector<8x256xf32>, i32 -> vector<8x256xf32>
    %29 = vector.extract_strided_slice %0 {offsets = [7, 0], sizes = [1, 256], strides = [1, 1]} : vector<9x256xf32> to vector<1x256xf32>
    %30 = vector.broadcast %29 : vector<1x256xf32> to vector<8x256xf32>
    %31 = arith.mulf %28, %30 : vector<8x256xf32>
    %c239_i32 = arith.constant 239 : i32
    %32 = tpu.dynamic_rotate %2 by %c239_i32 dim 1 : vector<8x256xf32>, i32 -> vector<8x256xf32>
    %33 = vector.extract_strided_slice %0 {offsets = [8, 0], sizes = [1, 256], strides = [1, 1]} : vector<9x256xf32> to vector<1x256xf32>
    %34 = vector.broadcast %33 : vector<1x256xf32> to vector<8x256xf32>
    %35 = arith.mulf %32, %34 : vector<8x256xf32>
    %36 = tpu.concatenate %7, %11, %15, %19, %2, %23, %27, %31, %35 in 0 : vector<8x256xf32>, vector<8x256xf32>, vector<8x256xf32>, vector<8x256xf32>, vector<8x256xf32>, vector<8x256xf32>, vector<8x256xf32>, vector<8x256xf32>, vector<8x256xf32> -> vector<72x256xf32>
    %37 = arith.truncf %36 : vector<72x256xf32> to vector<72x256xbf16>
    %cst = arith.constant dense<0.000000e+00> : vector<8x256xf32>
    %38 = tpu.matmul %3, %37, %cst {dimension_numbers = #tpu.dot_dimension_numbers<[1], [0], [0], [1], [0, 0, 1, 1], [], []>} : vector<8x72xbf16>, vector<72x256xbf16>, vector<8x256xf32> -> vector<8x256xf32>
    %c0_6 = arith.constant 0 : index
    %c0_7 = arith.constant 0 : index
    %39 = vector.load %arg4[%c0_6, %c0_7] : memref<8x1xf32, #tpu.memory_space<vmem>>, vector<8x1xf32>
    %40 = vector.broadcast %39 : vector<8x1xf32> to vector<8x256xf32>
    %41 = arith.addf %38, %40 : vector<8x256xf32>
    %cst_8 = arith.constant 0.000000e+00 : f32
    %42 = vector.broadcast %cst_8 : f32 to vector<8x256xf32>
    %43 = arith.maximumf %41, %42 : vector<8x256xf32>
    %c0_9 = arith.constant 0 : index
    %c0_10 = arith.constant 0 : index
    %c0_11 = arith.constant 0 : index
    %44 = vector.load %arg7[%c0_9, %c0_10, %c0_11] : memref<1x8x256xf32, #tpu.memory_space<vmem>>, vector<1x8x256xf32>
    %45 = vector.shape_cast %44 : vector<1x8x256xf32> to vector<8x256xf32>
    %46 = vector.shape_cast %41 : vector<8x256xf32> to vector<1x8x256xf32>
    tpu.vector_store %arg7[%c0_9, %c0_10, %c0_11], %46 {strides = array<i32>} : memref<1x8x256xf32, #tpu.memory_space<vmem>>, vector<1x8x256xf32>,
    %c0_12 = arith.constant 0 : index
    %c0_13 = arith.constant 0 : index
    %c0_14 = arith.constant 0 : index
    %47 = vector.load %arg8[%c0_12, %c0_13, %c0_14] : memref<1x8x256xf32, #tpu.memory_space<vmem>>, vector<1x8x256xf32>
    %48 = vector.shape_cast %47 : vector<1x8x256xf32> to vector<8x256xf32>
    %49 = vector.shape_cast %43 : vector<8x256xf32> to vector<1x8x256xf32>
    tpu.vector_store %arg8[%c0_12, %c0_13, %c0_14], %49 {strides = array<i32>} : memref<1x8x256xf32, #tpu.memory_space<vmem>>, vector<1x8x256xf32>,
    %c0_15 = arith.constant 0 : index
    %c0_16 = arith.constant 0 : index
    %50 = vector.load %arg5[%c0_15, %c0_16] : memref<16x72xbf16, #tpu.memory_space<vmem>>, vector<16x72xbf16>
    %c17_i32_17 = arith.constant 17 : i32
    %51 = tpu.dynamic_rotate %43 by %c17_i32_17 dim 1 : vector<8x256xf32>, i32 -> vector<8x256xf32>
    %52 = vector.extract_strided_slice %0 {offsets = [0, 0], sizes = [1, 256], strides = [1, 1]} : vector<9x256xf32> to vector<1x256xf32>
    %53 = vector.broadcast %52 : vector<1x256xf32> to vector<8x256xf32>
    %54 = arith.mulf %51, %53 : vector<8x256xf32>
    %c16_i32_18 = arith.constant 16 : i32
    %55 = tpu.dynamic_rotate %43 by %c16_i32_18 dim 1 : vector<8x256xf32>, i32 -> vector<8x256xf32>
    %56 = vector.extract_strided_slice %0 {offsets = [1, 0], sizes = [1, 256], strides = [1, 1]} : vector<9x256xf32> to vector<1x256xf32>
    %57 = vector.broadcast %56 : vector<1x256xf32> to vector<8x256xf32>
    %58 = arith.mulf %55, %57 : vector<8x256xf32>
    %c15_i32_19 = arith.constant 15 : i32
    %59 = tpu.dynamic_rotate %43 by %c15_i32_19 dim 1 : vector<8x256xf32>, i32 -> vector<8x256xf32>
    %60 = vector.extract_strided_slice %0 {offsets = [2, 0], sizes = [1, 256], strides = [1, 1]} : vector<9x256xf32> to vector<1x256xf32>
    %61 = vector.broadcast %60 : vector<1x256xf32> to vector<8x256xf32>
    %62 = arith.mulf %59, %61 : vector<8x256xf32>
    %c1_i32_20 = arith.constant 1 : i32
    %63 = tpu.dynamic_rotate %43 by %c1_i32_20 dim 1 : vector<8x256xf32>, i32 -> vector<8x256xf32>
    %64 = vector.extract_strided_slice %0 {offsets = [3, 0], sizes = [1, 256], strides = [1, 1]} : vector<9x256xf32> to vector<1x256xf32>
    %65 = vector.broadcast %64 : vector<1x256xf32> to vector<8x256xf32>
    %66 = arith.mulf %63, %65 : vector<8x256xf32>
    %c255_i32_21 = arith.constant 255 : i32
    %67 = tpu.dynamic_rotate %43 by %c255_i32_21 dim 1 : vector<8x256xf32>, i32 -> vector<8x256xf32>
    %68 = vector.extract_strided_slice %0 {offsets = [5, 0], sizes = [1, 256], strides = [1, 1]} : vector<9x256xf32> to vector<1x256xf32>
    %69 = vector.broadcast %68 : vector<1x256xf32> to vector<8x256xf32>
    %70 = arith.mulf %67, %69 : vector<8x256xf32>
    %c241_i32_22 = arith.constant 241 : i32
    %71 = tpu.dynamic_rotate %43 by %c241_i32_22 dim 1 : vector<8x256xf32>, i32 -> vector<8x256xf32>
    %72 = vector.extract_strided_slice %0 {offsets = [6, 0], sizes = [1, 256], strides = [1, 1]} : vector<9x256xf32> to vector<1x256xf32>
    %73 = vector.broadcast %72 : vector<1x256xf32> to vector<8x256xf32>
    %74 = arith.mulf %71, %73 : vector<8x256xf32>
    %c240_i32_23 = arith.constant 240 : i32
    %75 = tpu.dynamic_rotate %43 by %c240_i32_23 dim 1 : vector<8x256xf32>, i32 -> vector<8x256xf32>
    %76 = vector.extract_strided_slice %0 {offsets = [7, 0], sizes = [1, 256], strides = [1, 1]} : vector<9x256xf32> to vector<1x256xf32>
    %77 = vector.broadcast %76 : vector<1x256xf32> to vector<8x256xf32>
    %78 = arith.mulf %75, %77 : vector<8x256xf32>
    %c239_i32_24 = arith.constant 239 : i32
    %79 = tpu.dynamic_rotate %43 by %c239_i32_24 dim 1 : vector<8x256xf32>, i32 -> vector<8x256xf32>
    %80 = vector.extract_strided_slice %0 {offsets = [8, 0], sizes = [1, 256], strides = [1, 1]} : vector<9x256xf32> to vector<1x256xf32>
    %81 = vector.broadcast %80 : vector<1x256xf32> to vector<8x256xf32>
    %82 = arith.mulf %79, %81 : vector<8x256xf32>
    %83 = tpu.concatenate %54, %58, %62, %66, %43, %70, %74, %78, %82 in 0 : vector<8x256xf32>, vector<8x256xf32>, vector<8x256xf32>, vector<8x256xf32>, vector<8x256xf32>, vector<8x256xf32>, vector<8x256xf32>, vector<8x256xf32>, vector<8x256xf32> -> vector<72x256xf32>
    %84 = arith.truncf %83 : vector<72x256xf32> to vector<72x256xbf16>
    %cst_25 = arith.constant dense<0.000000e+00> : vector<16x256xf32>
    %85 = tpu.matmul %50, %84, %cst_25 {dimension_numbers = #tpu.dot_dimension_numbers<[1], [0], [0], [1], [0, 0, 1, 1], [], []>} : vector<16x72xbf16>, vector<72x256xbf16>, vector<16x256xf32> -> vector<16x256xf32>
    %c0_26 = arith.constant 0 : index
    %c0_27 = arith.constant 0 : index
    %86 = vector.load %arg6[%c0_26, %c0_27] : memref<16x1xf32, #tpu.memory_space<vmem>>, vector<16x1xf32>
    %87 = vector.broadcast %86 : vector<16x1xf32> to vector<16x256xf32>
    %88 = arith.addf %85, %87 : vector<16x256xf32>
    %cst_28 = arith.constant 0.000000e+00 : f32
    %89 = vector.broadcast %cst_28 : f32 to vector<16x256xf32>
    %90 = arith.maximumf %88, %89 : vector<16x256xf32>
    %cst_29 = arith.constant dense<0.000000e+00> : vector<16xf32>
    %91 = vector.multi_reduction <add>, %90, %cst_29 [1] : vector<16x256xf32> to vector<16xf32>
    %92 = vector.shape_cast %91 : vector<16xf32> to vector<16x1xf32>
    %cst_30 = arith.constant 3.906250e-03 : f32
    %93 = vector.broadcast %cst_30 : f32 to vector<16x1xf32>
    %94 = arith.mulf %92, %93 : vector<16x1xf32>
    %c0_31 = arith.constant 0 : index
    %c0_32 = arith.constant 0 : index
    %c0_33 = arith.constant 0 : index
    %95 = vector.load %arg9[%c0_31, %c0_32, %c0_33] : memref<1x16x1xf32, #tpu.memory_space<vmem>>, vector<1x16x1xf32>
    %96 = vector.shape_cast %95 : vector<1x16x1xf32> to vector<16x1xf32>
    %97 = vector.shape_cast %94 : vector<16x1xf32> to vector<1x16x1xf32>
    tpu.vector_store %arg9[%c0_31, %c0_32, %c0_33], %97 {strides = array<i32>} : memref<1x16x1xf32, #tpu.memory_space<vmem>>, vector<1x16x1xf32>,
    return
  }
  func.func @transform_0(%arg0: i32) -> (i32, i32) {
    %c0_i32 = arith.constant 0 : i32
    %c0_i32_0 = arith.constant 0 : i32
    %c0_i32_1 = arith.constant 0 : i32
    return %c0_i32, %c0_i32_0 : i32, i32
  }
  func.func @transform_1(%arg0: i32) -> (i32, i32, i32) {
    %c0_i32 = arith.constant 0 : i32
    %c0_i32_0 = arith.constant 0 : i32
    %c0_i32_1 = arith.constant 0 : i32
    return %arg0, %c0_i32, %c0_i32_0 : i32, i32, i32
  }
  func.func @transform_2(%arg0: i32) -> (i32, i32) {
    %c0_i32 = arith.constant 0 : i32
    %c0_i32_0 = arith.constant 0 : i32
    %c0_i32_1 = arith.constant 0 : i32
    return %c0_i32, %c0_i32_0 : i32, i32
  }
  func.func @transform_3(%arg0: i32) -> (i32, i32) {
    %c0_i32 = arith.constant 0 : i32
    %c0_i32_0 = arith.constant 0 : i32
    %c0_i32_1 = arith.constant 0 : i32
    return %c0_i32, %c0_i32_0 : i32, i32
  }
  func.func @transform_4(%arg0: i32) -> (i32, i32) {
    %c0_i32 = arith.constant 0 : i32
    %c0_i32_0 = arith.constant 0 : i32
    %c0_i32_1 = arith.constant 0 : i32
    return %c0_i32, %c0_i32_0 : i32, i32
  }
  func.func @transform_5(%arg0: i32) -> (i32, i32) {
    %c0_i32 = arith.constant 0 : i32
    %c0_i32_0 = arith.constant 0 : i32
    %c0_i32_1 = arith.constant 0 : i32
    return %c0_i32, %c0_i32_0 : i32, i32
  }
  func.func @transform_6(%arg0: i32) -> (i32, i32, i32) {
    %c0_i32 = arith.constant 0 : i32
    %c0_i32_0 = arith.constant 0 : i32
    %c0_i32_1 = arith.constant 0 : i32
    return %arg0, %c0_i32, %c0_i32_0 : i32, i32, i32
  }
  func.func @transform_7(%arg0: i32) -> (i32, i32, i32) {
    %c0_i32 = arith.constant 0 : i32
    %c0_i32_0 = arith.constant 0 : i32
    %c0_i32_1 = arith.constant 0 : i32
    return %arg0, %c0_i32, %c0_i32_0 : i32, i32, i32
  }
  func.func @transform_8(%arg0: i32) -> (i32, i32, i32) {
    %c0_i32 = arith.constant 0 : i32
    %c0_i32_0 = arith.constant 0 : i32
    %c0_i32_1 = arith.constant 0 : i32
    return %arg0, %c0_i32, %c0_i32_0 : i32, i32, i32
  }
}

</mosaic_0001>

<bundles_post_ra>
// kernel: fused_feature_forward.1
= control target key start
LH: loop header
LB: loop body
LE: loop exit
PB: predicated region body
PF: predicated region fallthrough
CT: control target
= control target key end

     0   :  { %s940_s27 = smov 0   ;;  %s1245_s0 = inlined_call_operand.vmem [shape: f32[9,256], index: 0, kind: input, shape index: {}]   ;;  %s1246_s1 = inlined_call_operand.vmem [shape: f32[2,8,256], index: 1, kind: input, shape index: {}]   ;;  %s1247_s2 = inlined_call_operand.vmem [shape: bf16[8,72], index: 2, kind: input, shape index: {}]   ;;  %s1248_s3 = inlined_call_operand.vmem [shape: f32[8,1], index: 3, kind: input, shape index: {}]   ;;  %s1249_s4 = inlined_call_operand.vmem [shape: bf16[16,72], index: 4, kind: input, shape index: {}]   ;;  %s1250_s5 = inlined_call_operand.vmem [shape: f32[16,1], index: 5, kind: input, shape index: {}]   ;;  %s1251_s6 = inlined_call_operand.vmem [shape: f32[2,8,256], index: 6, kind: output, shape index: {0}]   ;;  %s1252_s7 = inlined_call_operand.vmem [shape: f32[2,8,256], index: 7, kind: output, shape index: {1}]   ;;  %s1253_s8 = inlined_call_operand.vmem [shape: f32[2,16,1], index: 8, kind: output, shape index: {2}]  }
   0x1 LB: > { %s832_s28 = sadd.s32 4294967295, %s884_s27   ;;  %p836_p0 = scmp.ge.s32.totalorder %s884_s27, 1  ;;  %s884_s27 = sphi %s940_s27, %s19_s27  }
   0x2   : > { %p267_p1 = scmp.lt.s32.totalorder %s884_s27, 3 }
   0x4   : > { %p268_p2 = pnand %p836_p0, %p267_p1 }
   0x5   : > { %p311_p3 = scmp.lt.s32.totalorder (!%p268_p2), %s832_s28, 1  ;;  %s886_s11 = smov (!%p268_p2), 16   ;;  %v892_v2 = vmov (!%p268_p2), 0   ;;  %v487_v3 = vld [vmem:[%s1248_s3] sm:$0xff] (!%p268_p2)  ;;  %v343_v4 = vlaneseq (!%p268_p2)  ;;  %v1007_v10 = vld [vmem:[%s1245_s0 + $0x8] sm:$0xff] (!%p268_p2)  ;;  %vm497_vm8 = vcmask (!%p268_p2), 1043456  }
   0x6   : > { %271 = sbr.rel (%p268_p2) target bundleno = 907 (0x38b), region = 44  ;;  %s887_s12 = smov (!%p268_p2), 17   ;;  %536 = vmatprep.mubr.bf16.mxu0 (!%p268_p2), %v892_v2  ;;  %875 = vset.pattern.permute.xlu0 (!%p268_p2), %v892_v2  ;;  %v1002_v9 = vld [vmem:[%s1245_s0] sm:$0xff] (!%p268_p2)  ;;  %vm493_vm9 = vcmask (!%p268_p2), 588800   ;;  %vm708_vm10 = vcmask (!%p268_p2), 7168  }
   0x7   : > { %s888_s13 = smov (!%p268_p2), 15   ;;  %s889_s14 = smov (!%p268_p2), 1   ;;  %685 = vmatprep.mubr.bf16.mxu1 (!%p268_p2), %v892_v2  ;;  %876 = vset.pattern.permute.xlu1 (!%p268_p2), %v892_v2  ;;  %v993_v5 = vshrl.u32 (!%p268_p2), %v343_v4, 7  ;;  %v995_v6 = vand.u32 (!%p268_p2), 127, %v343_v4 }
   0x8   : > { %s890_s15 = smov (!%p268_p2), 127   ;;  %s891_s16 = smov (!%p268_p2), 113  }
   0x9   : > { %s893_s17 = smov (!%p268_p2), 112   ;;  %s894_s18 = smov (!%p268_p2), 111   ;;  %v367_v7 = vsub.s32 (!%p268_p2), 1, %v993_v5  ;;  %v350_v8 = vsub.s32 (!%p268_p2), 0, %v993_v5  ;;  %vm362_vm0 = vcmp.lt.s32.totalorder (!%p268_p2), %v995_v6, 16  ;;  %vm345_vm1 = vcmp.lt.s32.totalorder (!%p268_p2), %v995_v6, 17 }
   0xa   : > { %v384_v19 = vsub.s32 (!%p268_p2), 2, %v993_v5  ;;  %v401_v20 = vsub.s32 (!%p268_p2), 3, %v993_v5  ;;  %vm379_vm2 = vcmp.lt.s32.totalorder (!%p268_p2), %v995_v6, 15  ;;  %vm396_vm3 = vcmp.lt.s32.totalorder (!%p268_p2), %v995_v6, 1 }
   0xb   : > { %v1012_v13 = vrot.slane (!%p268_p2), %v1002_v9, %v367_v7  ;;  %v1015_v14 = vrot.slane (!%p268_p2), %v1002_v9, %v350_v8  ;;  %v1018_v15 = vrot.slane (!%p268_p2), %v1007_v10, %v350_v8  ;;  %v1021_v16 = vrot.slane (!%p268_p2), %v1007_v10, %v367_v7 }
   0xc   : > { %v418_v33 = vsub.s32 (!%p268_p2), 5, %v993_v5  ;;  %v1041_v34 = vrot.slane (!%p268_p2), %v1002_v9, %v384_v19  ;;  %v1044_v35 = vrot.slane (!%p268_p2), %v1007_v10, %v384_v19  ;;  %v1047_v36 = vrot.slane (!%p268_p2), %v1002_v9, %v401_v20  ;;  %v1111_v19 = vld [vmem:[%s1245_s0 + $0x10] ss:$0 sm:$0xff] (!%p268_p2) }
   0xd   : > { %s1255_s28 = smov (!%p311_p3, %s832_s28), 1  ;;  %v1050_v37 = vrot.slane %v1007_v10, %v401_v20  ;;  %vm413_vm4 = vcmp.lt.s32.totalorder %v995_v6, 127  ;;  %v435_v56 = vsub.s32 6, %v993_v5  ;;  %v452_v59 = vsub.s32 7, %v993_v5  ;;  %v1116_v20 = vld [vmem:[%s1245_s0 + $0x18] ss:$0 sm:$0xff] }
   0xe   : > { %s948_s29 = sshll.u32 %s1255_s28, 4  ;;  %v1062_v44 = vrot.slane %v1002_v9, %v418_v33  ;;  %v1065_v45 = vrot.slane %v1007_v10, %v418_v33  ;;  %vm430_vm5 = vcmp.lt.s32.totalorder %v995_v6, 113  ;;  %vm447_vm6 = vcmp.lt.s32.totalorder %v995_v6, 112 }
   0xf   : > { %s315_s10 = scalar_lea.vmem %s1246_s1, %s948_s29  ;;  %v1083_v2 = vrot.slane %v1002_v9, %v435_v56  ;;  %v1090_v4 = vrot.slane %v1002_v9, %v452_v59  ;;  %v1093_v5 = vrot.slane %v1007_v10, %v452_v59  ;;  %vm464_vm7 = vcmp.lt.s32.totalorder %v995_v6, 111  ;;  %s320_s21 = scalar_lea.vmem %s1251_s6, %s948_s29 }
  0x10   : > { %v954_v0 = vld [vmem:[%s315_s10] sm:$0xff]  ;;  %v960_v1 = vld [vmem:[%s315_s10 + $0x8] sm:$0xff]  ;;  %s325_s24 = scalar_lea.vmem %s1252_s7, %s948_s29  ;;  %s330_s25 = scalar_lea.vmem %s1253_s8, %s948_s29 }
  0x11   : > { %358 = vrot.lane.b32.xlu1 %v954_v0, %s886_s11  ;;  %339 = vrot.lane.b32.xlu0 %v954_v0, %s887_s12 }
  0x15   : > { %360 = vrot.lane.b32.xlu1 %v960_v1, %s886_s11  ;;  %341 = vrot.lane.b32.xlu0 %v960_v1, %s887_s12 }
  0x19   : > { %377 = vrot.lane.b32.xlu1 %v960_v1, %s888_s13  ;;  %375 = vrot.lane.b32.xlu0 %v954_v0, %s888_s13 }
  0x1d   : > { %394 = vrot.lane.b32.xlu1 %v960_v1, %s889_s14  ;;  %392 = vrot.lane.b32.xlu0 %v954_v0, %s889_s14 }
  0x21   : > { %411 = vrot.lane.b32.xlu1 %v960_v1, %s890_s15  ;;  %409 = vrot.lane.b32.xlu0 %v954_v0, %s890_s15 }
  0x25   : > { %428 = vrot.lane.b32.xlu1 %v960_v1, %s891_s16  ;;  %426 = vrot.lane.b32.xlu0 %v954_v0, %s891_s16 }
  0x29   : > { %445 = vrot.lane.b32.xlu1 %v960_v1, %s893_s17  ;;  %443 = vrot.lane.b32.xlu0 %v954_v0, %s893_s17 }
  0x2d   : > { %462 = vrot.lane.b32.xlu1 %v960_v1, %s894_s18  ;;  %460 = vrot.lane.b32.xlu0 %v954_v0, %s894_s18 }
  0x31   : > { %490 = vperm.xlu0 %875, %v487_v3   ;;  %v1086_v3 = vrot.slane %v1007_v10, %v435_v56 }
  0x83   : > { %v359_v11 = vpop.permute.xlu1 %358  ;;  %v340_v12 = vpop.permute.xlu0 %339 }
  0x87   : > { %v361_v17 = vpop.permute.xlu1 %360  ;;  %v342_v18 = vpop.permute.xlu0 %341 }
  0x88   : > { %v363_v21 = vsel %vm362_vm0, %v359_v11, %v361_v17  ;;  %v364_v22 = vsel %vm362_vm0, %v361_v17, %v359_v11  ;;  %v346_v23 = vsel %vm345_vm1, %v340_v12, %v342_v18  ;;  %v347_v24 = vsel %vm345_vm1, %v342_v18, %v340_v12 }
  0x89   : > { %v373_v25 = vmul.f32 %v1012_v13, %v364_v22  ;;  %v356_v26 = vmul.f32 %v1015_v14, %v347_v24  ;;  %v357_v27 = vmul.f32 %v1018_v15, %v346_v23  ;;  %v374_v28 = vmul.f32 %v1021_v16, %v363_v21 }
  0x8b   : > { %v378_v29 = vpop.permute.xlu1 %377  ;;  %v376_v30 = vpop.permute.xlu0 %375  ;;  %v478_v31 = vpack.c.bf16 %v374_v28, %v357_v27  ;;  %v477_v32 = vpack.c.bf16 %v373_v25, %v356_v26 }
  0x8c   : > { %v380_v38 = vsel %vm379_vm2, %v376_v30, %v378_v29  ;;  %v381_v39 = vsel %vm379_vm2, %v378_v29, %v376_v30 }
  0x8d   : > { %504 = vmatprep.subr.bf16.mxu0 %v478_v31  ;;  %v390_v46 = vmul.f32 %v1041_v34, %v381_v39  ;;  %v391_v47 = vmul.f32 %v1044_v35, %v380_v38 }
  0x8e   : > { %505 = vmatpush1.bf16.msra.mxu0 %v477_v32  ;;  %v338_v32 = vld [vmem:[%s1247_s2] sm:$0xf] }
  0x8f   : > { %v395_v40 = vpop.permute.xlu1 %394  ;;  %v393_v41 = vpop.permute.xlu0 %392 }
  0x90   : > { %v397_v42 = vsel %vm396_vm3, %v393_v41, %v395_v40  ;;  %v398_v43 = vsel %vm396_vm3, %v395_v40, %v393_v41 }
  0x91   : > { %v407_v48 = vmul.f32 %v1047_v36, %v398_v43  ;;  %v408_v49 = vmul.f32 %v1050_v37, %v397_v42 }
  0x93   : > { %v412_v50 = vpop.permute.xlu1 %411  ;;  %v410_v51 = vpop.permute.xlu0 %409  ;;  %v480_v52 = vpack.c.bf16 %v408_v49, %v391_v47  ;;  %v479_v53 = vpack.c.bf16 %v407_v48, %v390_v46  ;;  %v627_v48 = vld [vmem:[%s1250_s5] sm:$0xff]  ;;  %v628_v49 = vld [vmem:[%s1250_s5 + $0x8] sm:$0xff] }
  0x94   : > { %v414_v54 = vsel %vm413_vm4, %v410_v51, %v412_v50  ;;  %v415_v55 = vsel %vm413_vm4, %v412_v50, %v410_v51 }
  0x95   : > { %v424_v57 = vmul.f32 %v1062_v44, %v414_v54  ;;  %v425_v58 = vmul.f32 %v1065_v45, %v415_v55  ;;  %506 = vmatprep.subr.bf16.mxu0 %v480_v52 }
  0x96   : > { %507 = vmatpush1.bf16.msra.mxu0 %v479_v53 }
  0x97   : > { %v429_v60 = vpop.permute.xlu1 %428  ;;  %v427_v61 = vpop.permute.xlu0 %426  ;;  %v482_v62 = vpack.c.bf16 %v425_v58, %v960_v1  ;;  %v481_v63 = vpack.c.bf16 %v424_v57, %v954_v0 }
  0x98   : > { %v431_v1 = vsel %vm430_vm5, %v427_v61, %v429_v60  ;;  %v432_v0 = vsel %vm430_vm5, %v429_v60, %v427_v61 }
  0x99   : > { %508 = vmatprep.subr.bf16.mxu0 %v482_v62  ;;  %v441_v9 = vmul.f32 %v1083_v2, %v431_v1  ;;  %v442_v10 = vmul.f32 %v1086_v3, %v432_v0 }
  0x9a   : > { %509 = vmatpush1.bf16.msra.mxu0 %v481_v63 }
  0x9b   : > { %v446_v7 = vpop.permute.xlu1 %445  ;;  %v444_v8 = vpop.permute.xlu0 %443 }
  0x9c   : > { %v448_v11 = vsel %vm447_vm6, %v444_v8, %v446_v7  ;;  %v449_v12 = vsel %vm447_vm6, %v446_v7, %v444_v8 }
  0x9d   : > { %v458_v17 = vmul.f32 %v1090_v4, %v448_v11  ;;  %v459_v18 = vmul.f32 %v1093_v5, %v449_v12 }
  0x9f   : > { %v463_v21 = vpop.permute.xlu1 %462  ;;  %v461_v22 = vpop.permute.xlu0 %460  ;;  %v484_v23 = vpack.c.bf16 %v459_v18, %v442_v10  ;;  %v483_v24 = vpack.c.bf16 %v458_v17, %v441_v9 }
  0xa0   : > { %v465_v25 = vsel %vm464_vm7, %v461_v22, %v463_v21  ;;  %v466_v26 = vsel %vm464_vm7, %v463_v21, %v461_v22 }
  0xa1   : > { %v475_v27 = vmul.f32 %v1111_v19, %v465_v25  ;;  %v476_v28 = vmul.f32 %v1116_v20, %v466_v26  ;;  %510 = vmatprep.subr.bf16.mxu0 %v484_v23 }
  0xa2   : > { %511 = vmatpush1.bf16.msra.mxu0 %v483_v24 }
  0xa3   : > { %v485_v29 = vpack.c.bf16 %v475_v27, %v475_v27  ;;  %v486_v30 = vpack.c.bf16 %v476_v28, %v476_v28 }
  0xa5   : > { %847 = vmatprep.subr.msk.bf16.mxu0 %vm497_vm8, %v486_v30  ;;  %v499_v31 = vsel %vm497_vm8, %v485_v29, 0 }
  0xa6   : > { %513 = vmatpush1.bf16.msra.mxu0 %v499_v31 }
  0xa9   : > { %848 = vmatmul.mubr.msk.bf16.vlgmr.msra.gmra.mrb[0].mxu0 %vm493_vm9, %v338_v32 }
  0xb0   : > { %v491_v33 = vpop.permute.xlu0 %490 }
 0x17c   : > { %v538_v38 = vpop.f32.mrb[0].mxu0 }
 0x17d   : > { %v539_v39 = vadd.f32 %v538_v38, %v491_v33  ;;  %v540_v40 = vpop.f32.mrb[1].mxu0 }
 0x17e   : > { %v541_v41 = vadd.f32 %v540_v40, %v491_v33  ;;  %v542_v42 = vpop.f32.mrb[2].mxu0 }
 0x17f   : > { %v1138_v43 = vmax.f32 %v539_v39, 0.0  ;;  %547 = vst [vmem:[%s320_s21] sm:$0xff] %v539_v39  ;;  %v543_v46 = vpop.f32.mrb[3].mxu0 }
 0x180   : > { %v1140_v47 = vmax.f32 %v541_v41, 0.0  ;;  %548 = vst [vmem:[%s320_s21 + $0x8] sm:$0xff] %v541_v41 }
 0x181   : > { %549 = vst [vmem:[%s325_s24] sm:$0xff] %v1138_v43  ;;  %561 = vrot.lane.b32.xlu0 %v1138_v43, %s886_s11  ;;  %553 = vrot.lane.b32.xlu1 %v1138_v43, %s887_s12 }
 0x182   : > { %550 = vst [vmem:[%s325_s24 + $0x8] sm:$0xff] %v1140_v47 }
 0x185   : > { %569 = vrot.lane.b32.xlu0 %v1138_v43, %s888_s13  ;;  %555 = vrot.lane.b32.xlu1 %v1140_v47, %s887_s12 }
 0x189   : > { %577 = vrot.lane.b32.xlu0 %v1138_v43, %s889_s14  ;;  %563 = vrot.lane.b32.xlu1 %v1140_v47, %s886_s11 }
 0x18d   : > { %585 = vrot.lane.b32.xlu0 %v1138_v43, %s890_s15  ;;  %571 = vrot.lane.b32.xlu1 %v1140_v47, %s888_s13 }
 0x191   : > { %593 = vrot.lane.b32.xlu0 %v1138_v43, %s891_s16  ;;  %579 = vrot.lane.b32.xlu1 %v1140_v47, %s889_s14 }
 0x195   : > { %601 = vrot.lane.b32.xlu0 %v1138_v43, %s893_s17  ;;  %587 = vrot.lane.b32.xlu1 %v1140_v47, %s890_s15 }
 0x199   : > { %609 = vrot.lane.b32.xlu0 %v1138_v43, %s894_s18  ;;  %595 = vrot.lane.b32.xlu1 %v1140_v47, %s891_s16 }
 0x19d   : > { %631 = vperm.xlu0 %875, %v627_v48   ;;  %603 = vrot.lane.b32.xlu1 %v1140_v47, %s893_s17  ;;  %v877_v48 = vld [vmem:[%s1249_s4] sm:$0xff]  }
 0x1a1   : > { %611 = vrot.lane.b32.xlu1 %v1140_v47, %s894_s18 }
 0x1a5   : > { %636 = vperm.xlu1 %876, %v628_v49  }
 0x1f3   : > { %v562_v50 = vpop.permute.xlu0 %561  ;;  %v554_v51 = vpop.permute.xlu1 %553 }
 0x1f7   : > { %v570_v52 = vpop.permute.xlu0 %569  ;;  %v556_v53 = vpop.permute.xlu1 %555 }
 0x1f8   : > { %v557_v54 = vsel %vm345_vm1, %v554_v51, %v556_v53  ;;  %v558_v55 = vsel %vm345_vm1, %v556_v53, %v554_v51 }
 0x1f9   : > { %v559_v60 = vmul.f32 %v558_v55, %v1015_v14  ;;  %v560_v62 = vmul.f32 %v557_v54, %v1018_v15 }
 0x1fb   : > { %v578_v56 = vpop.permute.xlu0 %577  ;;  %v564_v57 = vpop.permute.xlu1 %563 }
 0x1fc   : > { %v565_v58 = vsel %vm362_vm0, %v562_v50, %v564_v57  ;;  %v566_v59 = vsel %vm362_vm0, %v564_v57, %v562_v50 }
 0x1fd   : > { %v567_v61 = vmul.f32 %v566_v59, %v1012_v13  ;;  %v568_v63 = vmul.f32 %v565_v58, %v1021_v16 }
 0x1ff   : > { %v572_v1 = vpop.permute.xlu1 %571  ;;  %v618_v0 = vpack.c.bf16 %v568_v63, %v560_v62  ;;  %v617_v7 = vpack.c.bf16 %v567_v61, %v559_v60  ;;  %v586_v8 = vpop.permute.xlu0 %585 }
 0x200   : > { %v573_v11 = vsel %vm379_vm2, %v570_v52, %v572_v1  ;;  %v574_v12 = vsel %vm379_vm2, %v572_v1, %v570_v52 }
 0x201   : > { %653 = vmatprep.subr.bf16.mxu1 %v618_v0  ;;  %v575_v15 = vmul.f32 %v574_v12, %v1041_v34  ;;  %v576_v16 = vmul.f32 %v573_v11, %v1044_v35 }
 0x202   : > { %654 = vmatpush1.bf16.msra.mxu1 %v617_v7 }
 0x203   : > { %v580_v9 = vpop.permute.xlu1 %579  ;;  %v594_v18 = vpop.permute.xlu0 %593 }
 0x204   : > { %v581_v13 = vsel %vm396_vm3, %v578_v56, %v580_v9  ;;  %v582_v14 = vsel %vm396_vm3, %v580_v9, %v578_v56 }
 0x205   : > { %v583_v10 = vmul.f32 %v582_v14, %v1047_v36  ;;  %v584_v17 = vmul.f32 %v581_v13, %v1050_v37 }
 0x207   : > { %v588_v21 = vpop.permute.xlu1 %587  ;;  %v620_v22 = vpack.c.bf16 %v584_v17, %v576_v16  ;;  %v619_v23 = vpack.c.bf16 %v583_v10, %v575_v15  ;;  %v602_v27 = vpop.permute.xlu0 %601 }
 0x208   : > { %v589_v24 = vsel %vm413_vm4, %v586_v8, %v588_v21  ;;  %v590_v25 = vsel %vm413_vm4, %v588_v21, %v586_v8 }
 0x209   : > { %v591_v26 = vmul.f32 %v589_v24, %v1062_v44  ;;  %v592_v34 = vmul.f32 %v590_v25, %v1065_v45  ;;  %655 = vmatprep.subr.bf16.mxu1 %v620_v22 }
 0x20a   : > { %656 = vmatpush1.bf16.msra.mxu1 %v619_v23 }
 0x20b   : > { %v596_v35 = vpop.permute.xlu1 %595  ;;  %v622_v36 = vpack.c.bf16 %v592_v34, %v1140_v47  ;;  %v621_v37 = vpack.c.bf16 %v591_v26, %v1138_v43  ;;  %v610_v39 = vpop.permute.xlu0 %609 }
 0x20c   : > { %v597_v28 = vsel %vm430_vm5, %v594_v18, %v596_v35  ;;  %v598_v29 = vsel %vm430_vm5, %v596_v35, %v594_v18 }
 0x20d   : > { %657 = vmatprep.subr.bf16.mxu1 %v622_v36  ;;  %v599_v31 = vmul.f32 %v597_v28, %v1083_v2  ;;  %v600_v32 = vmul.f32 %v598_v29, %v1086_v3 }
 0x20e   : > { %658 = vmatpush1.bf16.msra.mxu1 %v621_v37 }
 0x20f   : > { %v604_v30 = vpop.permute.xlu1 %603 }
 0x210   : > { %v605_v44 = vsel %vm447_vm6, %v602_v27, %v604_v30  ;;  %v606_v45 = vsel %vm447_vm6, %v604_v30, %v602_v27 }
 0x211   : > { %v607_v33 = vmul.f32 %v605_v44, %v1090_v4  ;;  %v608_v38 = vmul.f32 %v606_v45, %v1093_v5 }
 0x213   : > { %v612_v40 = vpop.permute.xlu1 %611  ;;  %v624_v41 = vpack.c.bf16 %v608_v38, %v600_v32  ;;  %v623_v42 = vpack.c.bf16 %v607_v33, %v599_v31 }
 0x214   : > { %v613_v43 = vsel %vm464_vm7, %v610_v39, %v612_v40  ;;  %v614_v46 = vsel %vm464_vm7, %v612_v40, %v610_v39 }
 0x215   : > { %v615_v47 = vmul.f32 %v1111_v19, %v613_v43  ;;  %v616_v2 = vmul.f32 %v1116_v20, %v614_v46  ;;  %659 = vmatprep.subr.bf16.mxu1 %v624_v41 }
 0x216   : > { %660 = vmatpush1.bf16.msra.mxu1 %v623_v42 }
 0x217   : > { %v625_v3 = vpack.c.bf16 %v615_v47, %v615_v47  ;;  %v626_v4 = vpack.c.bf16 %v616_v2, %v616_v2 }
 0x219   : > { %850 = vmatprep.subr.msk.bf16.mxu1 %vm497_vm8, %v626_v4  ;;  %v648_v5 = vsel %vm497_vm8, %v625_v3, 0 }
 0x21a   : > { %662 = vmatpush1.bf16.msra.mxu1 %v648_v5 }
 0x21c   : > { %v632_v6 = vpop.permute.xlu0 %631 }
 0x21d   : > { %851 = vmatmul.mubr.msk.bf16.vlgmr.msra.gmra.mrb[0].mxu1 %vm493_vm9, %v877_v48 }
 0x224   : > { %v637_v19 = vpop.permute.xlu1 %636 }
 0x2f0   : > { %v687_v49 = vpop.f32.mrb[0].mxu1 }
 0x2f1   : > { %v688_v20 = vadd.f32 %v687_v49, %v632_v6  ;;  %v689_v50 = vpop.f32.mrb[1].mxu1 }
 0x2f2   : > { %v690_v51 = vadd.f32 %v689_v50, %v632_v6  ;;  %v691_v52 = vpop.f32.mrb[2].mxu1 }
 0x2f3   : > { %v696_v53 = vmax.f32 %v688_v20, 0.0  ;;  %v692_v54 = vadd.f32 %v691_v52, %v637_v19  ;;  %v693_v55 = vpop.f32.mrb[3].mxu1 }
 0x2f4   : > { %v697_v56 = vmax.f32 %v690_v51, 0.0  ;;  %v694_v57 = vadd.f32 %v693_v55, %v637_v19 }
 0x2f5   : > { %v698_v58 = vmax.f32 %v692_v54, 0.0 }
 0x2f6   : > { %v699_v59 = vmax.f32 %v694_v57, 0.0  ;;  %v700_v60 = vadd.f32 %v697_v56, %v696_v53 }
 0x2f8   : > { %701 = vadd.xlane.f32.xlu0 %v700_v60  ;;  %v703_v61 = vadd.f32 %v699_v59, %v698_v58 }
 0x2fa   : > { %704 = vadd.xlane.f32.xlu1 %v703_v61 }
 0x385   : > { %v702_v62 = vpop.xlane.xlu0 %701 }
 0x386   : > { %v706_v63 = vmul.f32 0.00390625, %v702_v62 }
 0x387   : > { %v705_v1 = vpop.xlane.xlu1 %704 }
 0x388   : > { %709 = vst.msk [vmem:[%s330_s25] sm:$0xff] %vm708_vm10, %v706_v63  ;;  %v707_v0 = vmul.f32 0.00390625, %v705_v1 }
 0x38a   : > { %710 = vst.msk [vmem:[%s330_s25 + $0x8] sm:$0xff] %vm708_vm10, %v707_v0 }
 0x38b PF: > { %s19_s27 = sadd.s32 1, %s884_s27  }
 0x38c   : > { %p16_p4 = scmp.ge.s32.totalorder %s19_s27, 4  }
 0x38e   :  { %18 = sbr.rel (!%p16_p4) target bundleno = 1 (0x1), region = 98 }

</bundles_post_ra>
